<compile_context>
chip_gen: v7x
topology: tpu7x:2x2x1
jax: 0.10.0
libtpu: 0.0.40
codegen_flags: <defaults>
</compile_context>

<pallas_src>
import jax
import jax.numpy as jnp
from jax import lax
from jax.experimental import pallas as pl
from jax.experimental.pallas import tpu as pltpu

_MARGIN = 0.1      # triplet margin (module default); gamma == 2.0 -> cost**2


# ----------------------------------------------------------------------------
# Fused kernel: image encode (pipelined K reduction) + text encode + losses.
# ----------------------------------------------------------------------------
def _posapl_fused_kernel(img_ref, wimg_ref, txt_ref, wtxt_ref, scale_ref,
                         cont_ref, trip_ref, acc_ref, txt_emb_ref):
    k = pl.program_id(0)

    # ---- first K step: zero the accumulator and do the text encode +
    #      normalization here so it overlaps the image K-reduction pipeline
    #      instead of lengthening the serial epilogue. ----
    @pl.when(k == 0)
    def _():
        acc_ref[...] = jnp.zeros_like(acc_ref)
        t = jnp.dot(txt_ref[...], wtxt_ref[...],
                    preferred_element_type=jnp.float32)               # (B, D) f32
        t = t * lax.rsqrt(jnp.sum(t * t, axis=1, keepdims=True) + 1e-12)
        txt_emb_ref[...] = t.astype(txt_emb_ref.dtype)                # bf16 VMEM

    # ---- image encoder: bf16 MXU matmul, f32 accumulation over K tiles ----
    acc_ref[...] += jnp.dot(img_ref[...], wimg_ref[...],
                            preferred_element_type=jnp.float32)

    # ---- last K step: normalize image emb, scores, contrastive + triplet ----
    @pl.when(k == pl.num_programs(0) - 1)
    def _():
        img = acc_ref[...]                                            # (B, D) f32
        img = img * lax.rsqrt(jnp.sum(img * img, axis=1, keepdims=True) + 1e-12)
        img_bf = img.astype(jnp.bfloat16)
        txt_bf = txt_emb_ref[...]                                     # (B, D) bf16
        B = img.shape[0]

        # scores[i, j] = <img_i, txt_j>  (== image_feat @ text_feat.t())
        # bf16 operands, f32 accumulation; single MXU matmul, reused by both losses.
        scores = lax.dot_general(img_bf, txt_bf, (((1,), (1,)), ((), ())),
                                 preferred_element_type=jnp.float32)  # (B, B) f32

        row_ids = lax.broadcasted_iota(jnp.int32, (B, B), 0)
        col_ids = lax.broadcasted_iota(jnp.int32, (B, B), 1)
        eye = row_ids == col_ids

        # diag(scores) as both a column and a row vector (no second matmul,
        # no f32 eye matrix) — exact parity with torch's _scores.diag().
        d = jnp.where(eye, scores, 0.0)
        diag_col = jnp.sum(d, axis=1, keepdims=True)                  # (B, 1)
        diag_row = jnp.sum(d, axis=0, keepdims=True)                  # (1, B)

        scale = scale_ref[0, 0]                                       # logit_scale
        logits = scale * scores

        # ----- contrastive loss (idx=None => labels = arange(B)) -----
        # Numerically stable per-row / per-column log-softmax (safe for large
        # learned logit_scale, unlike a single global max).
        row_max = jnp.max(logits, axis=1, keepdims=True)
        lse_row = row_max + jnp.log(jnp.sum(jnp.exp(logits - row_max),
                                            axis=1, keepdims=True))   # (B, 1)
        col_max = jnp.max(logits, axis=0, keepdims=True)
        lse_col = col_max + jnp.log(jnp.sum(jnp.exp(logits - col_max),
                                            axis=0, keepdims=True))   # (1, B)
        loss_i2t = jnp.mean(lse_row) - scale * jnp.mean(diag_col)
        loss_t2i = jnp.mean(lse_col) - scale * jnp.mean(diag_row)
        cont_ref[0, 0] = 0.5 * (loss_i2t + loss_t2i)

        # ----- triplet loss (margin=0.1, gamma=2.0, summed off-diagonal) -----
        # cost_s [i,j] = max(margin + scores[i,j] - diag[i], 0)
        cost_s = jnp.where(eye, 0.0,
                           jnp.maximum(_MARGIN + scores - diag_col, 0.0))
        total = jnp.sum(cost_s * cost_s)
        # cost_im[i,j] = max(margin + scores[i,j] - diag[j], 0)  (same scores
        # tile reused; diagonal broadcast as a row — no scores.T matmul).
        cost_im = jnp.where(eye, 0.0,
                            jnp.maximum(_MARGIN + scores - diag_row, 0.0))
        total = total + jnp.sum(cost_im * cost_im)
        trip_ref[0, 0] = 0.5 * total


# ----------------------------------------------------------------------------
# Generation-aware VMEM budget and K-tile planning.
# ----------------------------------------------------------------------------
def _vmem_budget_bytes():
    phys = 64 << 20                      # conservative default: v7x physical VMEM
    try:
        info = pltpu.get_tpu_info()
        phys = int(getattr(info, "vmem_capacity_bytes", phys))
    except Exception:
        pass                             # non-TPU trace / API drift: keep default
    return (phys * 3) // 4               # leave headroom for compiler internals


def _plan_tiling(B, K, D, Dt, budget):
    """Pick the largest K tile whose double-buffered bf16 (B,tk)+(tk,D) tiles
    plus resident/scratch state fit the VMEM budget.  Prefer the full K."""
    fixed = 2 * 2 * (B * Dt + Dt * D)    # resident txt/w_txt (double-buffered bf16)
    fixed += 4 * B * D                   # f32 image-embedding accumulator
    fixed += 2 * B * D                   # bf16 normalized text scratch
    fixed += 4 * 4 * B * B               # ~4 live BxB f32 finalize temps

    def step_bytes(tk):
        return 2 * 2 * (B * tk + tk * D)  # double-buffered bf16 image/weight tiles

    if fixed + step_bytes(K) <= budget:
        tk = K
    else:
        tk_cap = max(128, (budget - fixed) // (4 * (B + D)))
        tk_cap = (min(tk_cap, K) // 128) * 128
        tk = None
        t = tk_cap
        while t >= 128:
            if K % t == 0:
                tk = t
                break
            t -= 128
        if tk is None:
            tk = K                        # fallback: whole K in one block
    return tk, fixed + step_bytes(tk)


# ----------------------------------------------------------------------------
# Wrapper: single fused pallas_call.
# ----------------------------------------------------------------------------
def posapl_fused(img_flat, w_img, txt_pooled, w_txt, logit_scale):
    """img_flat [B,K] bf16, w_img [K,D] bf16, txt_pooled [B,Dt] bf16,
    w_txt [Dt,D] bf16, logit_scale [1,1] f32 -> (contrastive, triplet) f32."""
    B, K = img_flat.shape
    D = w_img.shape[1]
    Dt = txt_pooled.shape[1]

    budget = _vmem_budget_bytes()
    tk, needed = _plan_tiling(B, K, D, Dt, budget)
    n_k = K // tk
    vmem_limit = int(min(budget, max(2 * needed, 32 << 20)))

    flops = 2 * B * K * D + 2 * B * Dt * D + 2 * B * B * D
    bytes_accessed = 2 * (img_flat.size + w_img.size
                          + txt_pooled.size + w_txt.size) + 4 * 3
    cost = pl.CostEstimate(flops=flops, transcendentals=2 * B * B + 2 * B,
                           bytes_accessed=bytes_accessed)

    grid_spec = pltpu.PrefetchScalarGridSpec(
        num_scalar_prefetch=0,
        grid=(n_k,),
        in_specs=[
            pl.BlockSpec((B, tk), lambda k: (0, k)),       # image K tiles
            pl.BlockSpec((tk, D), lambda k: (k, 0)),       # w_img K tiles
            pl.BlockSpec((B, Dt), lambda k: (0, 0)),       # txt pooled (resident)
            pl.BlockSpec((Dt, D), lambda k: (0, 0)),       # w_txt (resident)
            pl.BlockSpec(memory_space=pltpu.MemorySpace.SMEM),   # logit_scale
        ],
        out_specs=(
            pl.BlockSpec(memory_space=pltpu.MemorySpace.SMEM),   # contrastive
            pl.BlockSpec(memory_space=pltpu.MemorySpace.SMEM),   # triplet
        ),
        scratch_shapes=[
            pltpu.VMEM((B, D), jnp.float32),    # image embedding accumulator
            pltpu.VMEM((B, D), jnp.bfloat16),   # normalized text embedding
        ],
    )

    cont, trip = pl.pallas_call(
        _posapl_fused_kernel,
        out_shape=(jax.ShapeDtypeStruct((1, 1), jnp.float32),
                   jax.ShapeDtypeStruct((1, 1), jnp.float32)),
        grid_spec=grid_spec,
        compiler_params=pltpu.CompilerParams(
            dimension_semantics=("arbitrary",),   # K is a reduction axis
            vmem_limit_bytes=vmem_limit),
        cost_estimate=cost,
    )(img_flat, w_img, txt_pooled, w_txt, logit_scale)
    return cont[0, 0], trip[0, 0]


# ----------------------------------------------------------------------------
# Full forward: (glue) flatten / token gather / mean pool, then fused kernel.
# ----------------------------------------------------------------------------
def posapl_forward(image, text_ids, params, pos=None, idx=None):
    # TODO(synk): the real module calls an external open_clip ViT-B/32 for
    # encode_image / encode_text (incl. POS-tag weighting via `pos`); those
    # encoders are replaced by deterministic linear projections + L2 norm, and
    # only the idx=None contrastive branch (the one forward() exercises) is kept.
    B = image.shape[0]
    # Activations cast to bf16 once here; weights are already stored in bf16
    # (no per-call HBM round-trip on the dominant weight traffic).
    img_flat = image.reshape(B, -1).astype(jnp.bfloat16)        # NCHW -> [B, C*H*W]

    tok = jnp.take(params["tok_emb"], text_ids, axis=0)         # [B, L, Dt] (glue)
    txt_pooled = jnp.mean(tok, axis=1).astype(jnp.bfloat16)     # [B, Dt]    (glue)

    return posapl_fused(img_flat, params["w_img"], txt_pooled,
                        params["w_txt"], params["logit_scale"])


if __name__ == "__main__":
    key = jax.random.PRNGKey(0)
    B, C, H, W = 8, 3, 16, 16        # image batch (NCHW); C*H*W = 768 (128-aligned)
    L, V = 8, 64                     # seq len, vocab
    D = 128                          # embedding dim (lane-dense)
    Dt = 128                         # pooled text feature width

    k1, k2, k3, k4, k5 = jax.random.split(key, 5)
    image = jax.random.normal(k1, (B, C, H, W), dtype=jnp.float32)
    text_ids = jax.random.randint(k2, (B, L), 0, V, dtype=jnp.int32)

    params = {
        # Weights stored persistently in bf16 (perf review: avoid wrapper cast).
        "w_img": (0.02 * jax.random.normal(k3, (C * H * W, D),
                                           dtype=jnp.float32)).astype(jnp.bfloat16),
        "tok_emb": 0.02 * jax.random.normal(k4, (V, Dt), dtype=jnp.float32),
        "w_txt": (0.02 * jax.random.normal(k5, (Dt, D),
                                           dtype=jnp.float32)).astype(jnp.bfloat16),
        # CLIP-style logit scale = 1 / 0.07
        "logit_scale": jnp.full((1, 1), 1.0 / 0.07, dtype=jnp.float32),
    }

    loss_contrastive, loss_triplet = posapl_forward(image, text_ids, params)
    jax.block_until_ready((loss_contrastive, loss_triplet))
    print("KERNEL_OK")
</pallas_src>

<mosaic_0001>
module attributes {stable_mosaic.version = 11 : i64} {
  func.func @_posapl_fused_kernel(%arg0: i32, %arg1: memref<8x768xbf16, #tpu.memory_space<vmem>>, %arg2: memref<768x128xbf16, #tpu.memory_space<vmem>>, %arg3: memref<8x128xbf16, #tpu.memory_space<vmem>>, %arg4: memref<128x128xbf16, #tpu.memory_space<vmem>>, %arg5: memref<1x1xf32, #tpu.memory_space<smem>>, %arg6: memref<1x1xf32, #tpu.memory_space<smem>>, %arg7: memref<1x1xf32, #tpu.memory_space<smem>>, %arg8: memref<8x128xf32, #tpu.memory_space<vmem>>, %arg9: memref<8x128xbf16, #tpu.memory_space<vmem>>) attributes {dimension_semantics = [#tpu.dimension_semantics<arbitrary>], iteration_bounds = array<i64: 1>, scalar_prefetch = 0 : i64, scratch_operands = 2 : i64, tpu.core_type = #tpu.core_type<tc>, window_params = [{transform_indices = @transform_0, window_bounds = array<i64: 8, 768>}, {transform_indices = @transform_1, window_bounds = array<i64: 768, 128>}, {pipeline_mode = #tpu.pipeline_mode<synchronous>, transform_indices = @transform_2, window_bounds = array<i64: 8, 128>}, {pipeline_mode = #tpu.pipeline_mode<synchronous>, transform_indices = @transform_3, window_bounds = array<i64: 128, 128>}, {transform_indices = @transform_4, window_bounds = array<i64: 1, 1>}, {transform_indices = @transform_5, window_bounds = array<i64: 1, 1>}, {transform_indices = @transform_6, window_bounds = array<i64: 1, 1>}]} {
    %c0_i32 = arith.constant 0 : i32
    %0 = arith.cmpi eq, %arg0, %c0_i32 : i32
    %1 = arith.extui %0 : i1 to i32
    %c0_i32_0 = arith.constant 0 : i32
    %2 = arith.cmpi ne, %1, %c0_i32_0 : i32
    scf.if %2 {
      %cst_10 = arith.constant 0.000000e+00 : f32
      %12 = vector.broadcast %cst_10 : f32 to vector<8x128xf32>
      %c0_11 = arith.constant 0 : index
      %c0_12 = arith.constant 0 : index
      %13 = vector.load %arg8[%c0_11, %c0_12] : memref<8x128xf32, #tpu.memory_space<vmem>>, vector<8x128xf32>
      tpu.vector_store %arg8[%c0_11, %c0_12], %12 {strides = array<i32>} : memref<8x128xf32, #tpu.memory_space<vmem>>, vector<8x128xf32>,
      %c0_13 = arith.constant 0 : index
      %c0_14 = arith.constant 0 : index
      %14 = vector.load %arg3[%c0_13, %c0_14] : memref<8x128xbf16, #tpu.memory_space<vmem>>, vector<8x128xbf16>
      %c0_15 = arith.constant 0 : index
      %c0_16 = arith.constant 0 : index
      %15 = vector.load %arg4[%c0_15, %c0_16] : memref<128x128xbf16, #tpu.memory_space<vmem>>, vector<128x128xbf16>
      %cst_17 = arith.constant dense<0.000000e+00> : vector<8x128xf32>
      %16 = tpu.matmul %14, %15, %cst_17 {dimension_numbers = #tpu.dot_dimension_numbers<[1], [0], [0], [1], [0, 0, 1, 1], [], []>} : vector<8x128xbf16>, vector<128x128xbf16>, vector<8x128xf32> -> vector<8x128xf32>
      %17 = arith.mulf %16, %16 : vector<8x128xf32>
      %cst_18 = arith.constant dense<0.000000e+00> : vector<8xf32>
      %18 = vector.multi_reduction <add>, %17, %cst_18 [1] : vector<8x128xf32> to vector<8xf32>
      %19 = vector.shape_cast %18 : vector<8xf32> to vector<8x1xf32>
      %cst_19 = arith.constant 9.99999996E-13 : f32
      %20 = vector.broadcast %cst_19 : f32 to vector<8x1xf32>
      %21 = arith.addf %19, %20 : vector<8x1xf32>
      %22 = math.rsqrt %21 : vector<8x1xf32>
      %23 = vector.broadcast %22 : vector<8x1xf32> to vector<8x128xf32>
      %24 = arith.mulf %16, %23 : vector<8x128xf32>
      %25 = arith.truncf %24 : vector<8x128xf32> to vector<8x128xbf16>
      %c0_20 = arith.constant 0 : index
      %c0_21 = arith.constant 0 : index
      %26 = vector.load %arg9[%c0_20, %c0_21] : memref<8x128xbf16, #tpu.memory_space<vmem>>, vector<8x128xbf16>
      tpu.vector_store %arg9[%c0_20, %c0_21], %25 {strides = array<i32>} : memref<8x128xbf16, #tpu.memory_space<vmem>>, vector<8x128xbf16>,
    } else {
    }
    %c0 = arith.constant 0 : index
    %c0_1 = arith.constant 0 : index
    %3 = vector.load %arg8[%c0, %c0_1] : memref<8x128xf32, #tpu.memory_space<vmem>>, vector<8x128xf32>
    %c0_2 = arith.constant 0 : index
    %c0_3 = arith.constant 0 : index
    %4 = vector.load %arg1[%c0_2, %c0_3] : memref<8x768xbf16, #tpu.memory_space<vmem>>, vector<8x768xbf16>
    %c0_4 = arith.constant 0 : index
    %c0_5 = arith.constant 0 : index
    %5 = vector.load %arg2[%c0_4, %c0_5] : memref<768x128xbf16, #tpu.memory_space<vmem>>, vector<768x128xbf16>
    %cst = arith.constant dense<0.000000e+00> : vector<8x128xf32>
    %6 = tpu.matmul %4, %5, %cst {dimension_numbers = #tpu.dot_dimension_numbers<[1], [0], [0], [1], [0, 0, 1, 1], [], []>} : vector<8x768xbf16>, vector<768x128xbf16>, vector<8x128xf32> -> vector<8x128xf32>
    %7 = arith.addf %3, %6 : vector<8x128xf32>
    %c0_6 = arith.constant 0 : index
    %c0_7 = arith.constant 0 : index
    %8 = vector.load %arg8[%c0_6, %c0_7] : memref<8x128xf32, #tpu.memory_space<vmem>>, vector<8x128xf32>
    tpu.vector_store %arg8[%c0_6, %c0_7], %7 {strides = array<i32>} : memref<8x128xf32, #tpu.memory_space<vmem>>, vector<8x128xf32>,
    %c0_i32_8 = arith.constant 0 : i32
    %9 = arith.cmpi eq, %arg0, %c0_i32_8 : i32
    %10 = arith.extui %9 : i1 to i32
    %c0_i32_9 = arith.constant 0 : i32
    %11 = arith.cmpi ne, %10, %c0_i32_9 : i32
    scf.if %11 {
      %c0_10 = arith.constant 0 : index
      %c0_11 = arith.constant 0 : index
      %12 = vector.load %arg8[%c0_10, %c0_11] : memref<8x128xf32, #tpu.memory_space<vmem>>, vector<8x128xf32>
      %13 = arith.mulf %12, %12 : vector<8x128xf32>
      %cst_12 = arith.constant dense<0.000000e+00> : vector<8xf32>
      %14 = vector.multi_reduction <add>, %13, %cst_12 [1] : vector<8x128xf32> to vector<8xf32>
      %15 = vector.shape_cast %14 : vector<8xf32> to vector<8x1xf32>
      %cst_13 = arith.constant 9.99999996E-13 : f32
      %16 = vector.broadcast %cst_13 : f32 to vector<8x1xf32>
      %17 = arith.addf %15, %16 : vector<8x1xf32>
      %18 = math.rsqrt %17 : vector<8x1xf32>
      %19 = vector.broadcast %18 : vector<8x1xf32> to vector<8x128xf32>
      %20 = arith.mulf %12, %19 : vector<8x128xf32>
      %21 = arith.truncf %20 : vector<8x128xf32> to vector<8x128xbf16>
      %c0_14 = arith.constant 0 : index
      %c0_15 = arith.constant 0 : index
      %22 = vector.load %arg9[%c0_14, %c0_15] : memref<8x128xbf16, #tpu.memory_space<vmem>>, vector<8x128xbf16>
      %cst_16 = arith.constant dense<0.000000e+00> : vector<8x8xf32>
      %23 = tpu.matmul %21, %22, %cst_16 {dimension_numbers = #tpu.dot_dimension_numbers<[1], [1], [0], [0], [0, 0, 1, 0], [], []>} : vector<8x128xbf16>, vector<8x128xbf16>, vector<8x8xf32> -> vector<8x8xf32>
      %24 = tpu.iota {dimensions = array<i32: 0>} : vector<8x8xi32>
      %25 = tpu.iota {dimensions = array<i32: 1>} : vector<8x8xi32>
      %26 = arith.cmpi eq, %24, %25 : vector<8x8xi32>
      %cst_17 = arith.constant 0.000000e+00 : f32
      %27 = vector.broadcast %cst_17 : f32 to vector<8x8xf32>
      %28 = arith.select %26, %23, %27 : vector<8x8xi1>, vector<8x8xf32>
      %cst_18 = arith.constant dense<0.000000e+00> : vector<8xf32>
      %29 = vector.multi_reduction <add>, %28, %cst_18 [1] : vector<8x8xf32> to vector<8xf32>
      %30 = vector.shape_cast %29 : vector<8xf32> to vector<8x1xf32>
      %cst_19 = arith.constant dense<0.000000e+00> : vector<8xf32>
      %31 = vector.multi_reduction <add>, %28, %cst_19 [0] : vector<8x8xf32> to vector<8xf32>
      %32 = vector.shape_cast %31 : vector<8xf32> to vector<1x8xf32>
      %c0_20 = arith.constant 0 : index
      %c0_21 = arith.constant 0 : index
      %33 = memref.load %arg5[%c0_20, %c0_21] : memref<1x1xf32, #tpu.memory_space<smem>>
      %34 = vector.broadcast %33 : f32 to vector<8x8xf32>
      %35 = arith.mulf %34, %23 : vector<8x8xf32>
      %cst_22 = arith.constant dense<0xFF800000> : vector<8xf32>
      %36 = vector.multi_reduction <maximumf>, %35, %cst_22 [1] : vector<8x8xf32> to vector<8xf32>
      %37 = vector.shape_cast %36 : vector<8xf32> to vector<8x1xf32>
      %38 = vector.broadcast %37 : vector<8x1xf32> to vector<8x8xf32>
      %39 = arith.subf %35, %38 : vector<8x8xf32>
      %40 = math.exp %39 : vector<8x8xf32>
      %cst_23 = arith.constant dense<0.000000e+00> : vector<8xf32>
      %41 = vector.multi_reduction <add>, %40, %cst_23 [1] : vector<8x8xf32> to vector<8xf32>
      %42 = vector.shape_cast %41 : vector<8xf32> to vector<8x1xf32>
      %43 = math.log %42 : vector<8x1xf32>
      %44 = arith.addf %37, %43 : vector<8x1xf32>
      %cst_24 = arith.constant dense<0xFF800000> : vector<8xf32>
      %45 = vector.multi_reduction <maximumf>, %35, %cst_24 [0] : vector<8x8xf32> to vector<8xf32>
      %46 = vector.shape_cast %45 : vector<8xf32> to vector<1x8xf32>
      %47 = vector.broadcast %46 : vector<1x8xf32> to vector<8x8xf32>
      %48 = arith.subf %35, %47 : vector<8x8xf32>
      %49 = math.exp %48 : vector<8x8xf32>
      %cst_25 = arith.constant dense<0.000000e+00> : vector<8xf32>
      %50 = vector.multi_reduction <add>, %49, %cst_25 [0] : vector<8x8xf32> to vector<8xf32>
      %51 = vector.shape_cast %50 : vector<8xf32> to vector<1x8xf32>
      %52 = math.log %51 : vector<1x8xf32>
      %53 = arith.addf %46, %52 : vector<1x8xf32>
      %54 = vector.shape_cast %44 : vector<8x1xf32> to vector<1x8x1xf32>
      %cst_26 = arith.constant dense<0.000000e+00> : vector<1xf32>
      %55 = vector.multi_reduction <add>, %54, %cst_26 [1, 2] : vector<1x8x1xf32> to vector<1xf32>
      %56 = vector.shape_cast %55 : vector<1xf32> to vector<1x1x1xf32>
      %57 = vector.extract %56[0, 0, 0] : f32 from vector<1x1x1xf32>
      %cst_27 = arith.constant 8.000000e+00 : f32
      %58 = arith.divf %57, %cst_27 : f32
      %59 = vector.shape_cast %30 : vector<8x1xf32> to vector<1x8x1xf32>
      %cst_28 = arith.constant dense<0.000000e+00> : vector<1xf32>
      %60 = vector.multi_reduction <add>, %59, %cst_28 [1, 2] : vector<1x8x1xf32> to vector<1xf32>
      %61 = vector.shape_cast %60 : vector<1xf32> to vector<1x1x1xf32>
      %62 = vector.extract %61[0, 0, 0] : f32 from vector<1x1x1xf32>
      %cst_29 = arith.constant 8.000000e+00 : f32
      %63 = arith.divf %62, %cst_29 : f32
      %64 = arith.mulf %33, %63 : f32
      %65 = arith.subf %58, %64 : f32
      %66 = vector.shape_cast %53 : vector<1x8xf32> to vector<1x1x8xf32>
      %cst_30 = arith.constant dense<0.000000e+00> : vector<1xf32>
      %67 = vector.multi_reduction <add>, %66, %cst_30 [1, 2] : vector<1x1x8xf32> to vector<1xf32>
      %68 = vector.shape_cast %67 : vector<1xf32> to vector<1x1x1xf32>
      %69 = vector.extract %68[0, 0, 0] : f32 from vector<1x1x1xf32>
      %cst_31 = arith.constant 8.000000e+00 : f32
      %70 = arith.divf %69, %cst_31 : f32
      %71 = vector.shape_cast %32 : vector<1x8xf32> to vector<1x1x8xf32>
      %cst_32 = arith.constant dense<0.000000e+00> : vector<1xf32>
      %72 = vector.multi_reduction <add>, %71, %cst_32 [1, 2] : vector<1x1x8xf32> to vector<1xf32>
      %73 = vector.shape_cast %72 : vector<1xf32> to vector<1x1x1xf32>
      %74 = vector.extract %73[0, 0, 0] : f32 from vector<1x1x1xf32>
      %cst_33 = arith.constant 8.000000e+00 : f32
      %75 = arith.divf %74, %cst_33 : f32
      %76 = arith.mulf %33, %75 : f32
      %77 = arith.subf %70, %76 : f32
      %78 = arith.addf %65, %77 : f32
      %cst_34 = arith.constant 5.000000e-01 : f32
      %79 = arith.mulf %cst_34, %78 : f32
      %c0_35 = arith.constant 0 : index
      %c0_36 = arith.constant 0 : index
      %80 = memref.load %arg6[%c0_35, %c0_36] : memref<1x1xf32, #tpu.memory_space<smem>>
      memref.store %79, %arg6[%c0_35, %c0_36] : memref<1x1xf32, #tpu.memory_space<smem>>
      %cst_37 = arith.constant 1.000000e-01 : f32
      %81 = vector.broadcast %cst_37 : f32 to vector<8x8xf32>
      %82 = arith.addf %81, %23 : vector<8x8xf32>
      %83 = vector.broadcast %30 : vector<8x1xf32> to vector<8x8xf32>
      %84 = arith.subf %82, %83 : vector<8x8xf32>
      %cst_38 = arith.constant 0.000000e+00 : f32
      %85 = vector.broadcast %cst_38 : f32 to vector<8x8xf32>
      %86 = arith.maximumf %84, %85 : vector<8x8xf32>
      %cst_39 = arith.constant 0.000000e+00 : f32
      %87 = vector.broadcast %cst_39 : f32 to vector<8x8xf32>
      %88 = arith.select %26, %87, %86 : vector<8x8xi1>, vector<8x8xf32>
      %89 = arith.mulf %88, %88 : vector<8x8xf32>
      %90 = vector.shape_cast %89 : vector<8x8xf32> to vector<1x8x8xf32>
      %cst_40 = arith.constant dense<0.000000e+00> : vector<1xf32>
      %91 = vector.multi_reduction <add>, %90, %cst_40 [1, 2] : vector<1x8x8xf32> to vector<1xf32>
      %92 = vector.shape_cast %91 : vector<1xf32> to vector<1x1x1xf32>
      %93 = vector.extract %92[0, 0, 0] : f32 from vector<1x1x1xf32>
      %cst_41 = arith.constant 1.000000e-01 : f32
      %94 = vector.broadcast %cst_41 : f32 to vector<8x8xf32>
      %95 = arith.addf %94, %23 : vector<8x8xf32>
      %96 = vector.broadcast %32 : vector<1x8xf32> to vector<8x8xf32>
      %97 = arith.subf %95, %96 : vector<8x8xf32>
      %cst_42 = arith.constant 0.000000e+00 : f32
      %98 = vector.broadcast %cst_42 : f32 to vector<8x8xf32>
      %99 = arith.maximumf %97, %98 : vector<8x8xf32>
      %cst_43 = arith.constant 0.000000e+00 : f32
      %100 = vector.broadcast %cst_43 : f32 to vector<8x8xf32>
      %101 = arith.select %26, %100, %99 : vector<8x8xi1>, vector<8x8xf32>
      %102 = arith.mulf %101, %101 : vector<8x8xf32>
      %103 = vector.shape_cast %102 : vector<8x8xf32> to vector<1x8x8xf32>
      %cst_44 = arith.constant dense<0.000000e+00> : vector<1xf32>
      %104 = vector.multi_reduction <add>, %103, %cst_44 [1, 2] : vector<1x8x8xf32> to vector<1xf32>
      %105 = vector.shape_cast %104 : vector<1xf32> to vector<1x1x1xf32>
      %106 = vector.extract %105[0, 0, 0] : f32 from vector<1x1x1xf32>
      %107 = arith.addf %93, %106 : f32
      %cst_45 = arith.constant 5.000000e-01 : f32
      %108 = arith.mulf %cst_45, %107 : f32
      %c0_46 = arith.constant 0 : index
      %c0_47 = arith.constant 0 : index
      %109 = memref.load %arg7[%c0_46, %c0_47] : memref<1x1xf32, #tpu.memory_space<smem>>
      memref.store %108, %arg7[%c0_46, %c0_47] : memref<1x1xf32, #tpu.memory_space<smem>>
    } else {
    }
    return
  }
  func.func @transform_0(%arg0: i32) -> (i32, i32) {
    %c0_i32 = arith.constant 0 : i32
    %c0_i32_0 = arith.constant 0 : i32
    return %c0_i32, %arg0 : i32, i32
  }
  func.func @transform_1(%arg0: i32) -> (i32, i32) {
    %c0_i32 = arith.constant 0 : i32
    %c0_i32_0 = arith.constant 0 : i32
    return %arg0, %c0_i32 : i32, i32
  }
  func.func @transform_2(%arg0: i32) -> (i32, i32) {
    %c0_i32 = arith.constant 0 : i32
    %c0_i32_0 = arith.constant 0 : i32
    %c0_i32_1 = arith.constant 0 : i32
    return %c0_i32, %c0_i32_0 : i32, i32
  }
  func.func @transform_3(%arg0: i32) -> (i32, i32) {
    %c0_i32 = arith.constant 0 : i32
    %c0_i32_0 = arith.constant 0 : i32
    %c0_i32_1 = arith.constant 0 : i32
    return %c0_i32, %c0_i32_0 : i32, i32
  }
  func.func @transform_4(%arg0: i32) -> (i32, i32) {
    %c0_i32 = arith.constant 0 : i32
    %c0_i32_0 = arith.constant 0 : i32
    %c0_i32_1 = arith.constant 0 : i32
    return %c0_i32, %c0_i32_0 : i32, i32
  }
  func.func @transform_5(%arg0: i32) -> (i32, i32) {
    %c0_i32 = arith.constant 0 : i32
    %c0_i32_0 = arith.constant 0 : i32
    %c0_i32_1 = arith.constant 0 : i32
    return %c0_i32, %c0_i32_0 : i32, i32
  }
  func.func @transform_6(%arg0: i32) -> (i32, i32) {
    %c0_i32 = arith.constant 0 : i32
    %c0_i32_0 = arith.constant 0 : i32
    %c0_i32_1 = arith.constant 0 : i32
    return %c0_i32, %c0_i32_0 : i32, i32
  }
}

</mosaic_0001>

<bundles_post_ra>
// kernel: tpu_custom_call.1
= control target key start
LH: loop header
LB: loop body
LE: loop exit
PB: predicated region body
PF: predicated region fallthrough
CT: control target
= control target key end

     0   :  { %13 = vsyncpa [#allocation6], 0  ;;  %s1452_s0 = inlined_call_operand.hbm [shape: bf16[8,768], index: 0, kind: input, shape index: {}]   ;;  %s1453_s1 = inlined_call_operand.hbm [shape: bf16[768,128], index: 1, kind: input, shape index: {}]   ;;  %s1454_s2 = inlined_call_operand.vmem [shape: bf16[8,128], index: 2, kind: input, shape index: {}]   ;;  %s1455_s3 = inlined_call_operand.hbm [shape: bf16[128,128], index: 3, kind: input, shape index: {}]   ;;  %s1456_s4 = inlined_call_operand.<no memory space> [shape: f32[1,1], index: 4, kind: input, shape index: {}]   ;;  %s1457_s5 = inlined_call_operand.hbm [shape: f32[1,1], index: 5, kind: output, shape index: {0}]   ;;  %s1458_s6 = inlined_call_operand.hbm [shape: f32[1,1], index: 6, kind: output, shape index: {1}]  }
   0x1   :  { %14 = vsyncpa [#allocation9], 0 }
   0x2   :  { %15 = vsyncpa [#allocation7], 0 }
   0x3   :  { %16 = vsyncpa [#allocation13], 0  ;;  %s1292_s21 = smov [#allocation8]   ;;  %s1198_s25 = scalar_lea.hbm %s1453_s1, 6144 }
   0x4   :  { %s32_s22 = sshll.u32 %s1292_s21, 4  ;;  %p1199_p0 = scmp.ne.s32.totalorder %s1453_s1, %s1198_s25  ;;  %s33_s22 = int_to_ptr.vmem [resolvable:$true] %s32_s22 }
   0x5   :  { %p1202_p1 = scmp.lt.u32.totalorder %s1198_s25, %s1453_s1 }
   0x7   :  { %p1204_p2 = pnand %p1202_p1, %p1199_p0 }
   0x9   :  { %1207 = shalt.err (!%p1204_p2)
}
   0xa   :  { %s1208_s30 = scalar_lea.vmem %s33_s22, 6144  ;;  %p1213_p4 = scmp.lt.s32.totalorder %s33_s22, %s33_s22 }
   0xb   :  { %p1209_p3 = scmp.ne.s32.totalorder %s33_s22, %s1208_s30  ;;  %p1214_p5 = scmp.lt.s32.totalorder %s1208_s30, %s1208_s30 }
   0xd   :  { %p1215_p6 = por %p1214_p5, %p1213_p4 }
   0xf   :  { %p1216_p7 = pnand %p1215_p6, %p1209_p3 }
  0x11   :  { %1219 = shalt.err (!%p1216_p7)
}
  0x12   :  { %s1293_s7 = smov 64   ;;  %s1294_s8 = smov 4  }
  0x13   :  { %38 = dma.hbm_to_vmem [thread:$0]  %s1453_s1, 6144, %s33_s22, [#allocation9], %s1293_s7, %s1293_s7, %s1294_s8  }
  0x14   :  { %s1295_s11 = smov [#allocation5]   ;;  %s1296_s13 = smov [#allocation10]  }
  0x15   :  { %s23_s12 = sshll.u32 %s1295_s11, 4  ;;  %s46_s14 = sshll.u32 %s1296_s13, 4  ;;  %s24_s12 = int_to_ptr.vmem [resolvable:$true] %s23_s12  ;;  %s47_s14 = int_to_ptr.vmem [resolvable:$true] %s46_s14 }
  0x16   :  { %s1220_s17 = scalar_lea.hbm %s1452_s0, 384 }
  0x17   :  { %p1221_p8 = scmp.ne.s32.totalorder %s1452_s0, %s1220_s17  ;;  %p1224_p9 = scmp.lt.u32.totalorder %s1220_s17, %s1452_s0 }
  0x19   :  { %p1226_p10 = pnand %p1224_p9, %p1221_p8 }
  0x1b   :  { %1229 = shalt.err (!%p1226_p10)
}
  0x1c   :  { %s1230_s1 = scalar_lea.vmem %s24_s12, 384  ;;  %p1235_p12 = scmp.lt.s32.totalorder %s24_s12, %s24_s12 }
  0x1d   :  { %p1231_p11 = scmp.ne.s32.totalorder %s24_s12, %s1230_s1  ;;  %p1236_p13 = scmp.lt.s32.totalorder %s1230_s1, %s1230_s1 }
  0x1f   :  { %p1237_p0 = por %p1236_p13, %p1235_p12 }
  0x21   :  { %p1238_p1 = pnand %p1237_p0, %p1231_p11 }
  0x23   :  { %1241 = shalt.err (!%p1238_p1)
}
  0x24   :  { %26 = dma.hbm_to_vmem [thread:$0]  %s1452_s0, 384, %s24_s12, [#allocation6]  }
  0x25   :  { %s1242_s26 = scalar_lea.hbm %s1455_s3, 1024 }
  0x26   :  { %p1243_p2 = scmp.ne.s32.totalorder %s1455_s3, %s1242_s26  ;;  %p1246_p3 = scmp.lt.u32.totalorder %s1242_s26, %s1455_s3 }
  0x28   :  { %p1248_p4 = pnand %p1246_p3, %p1243_p2 }
  0x2a   :  { %1251 = shalt.err (!%p1248_p4)
}
  0x2b   :  { %s1252_s9 = scalar_lea.vmem %s47_s14, 1024  ;;  %p1257_p6 = scmp.lt.s32.totalorder %s47_s14, %s47_s14 }
  0x2c   :  { %p1253_p5 = scmp.ne.s32.totalorder %s47_s14, %s1252_s9  ;;  %p1258_p7 = scmp.lt.s32.totalorder %s1252_s9, %s1252_s9 }
  0x2e   :  { %p1259_p8 = por %p1258_p7, %p1257_p6 }
  0x30   :  { %p1260_p9 = pnand %p1259_p8, %p1253_p5 }
  0x32   :  { %1263 = shalt.err (!%p1260_p9)
}
  0x33   :  { %52 = dma.hbm_to_vmem [thread:$0]  %s1455_s3, 1024, %s47_s14, [#allocation9], %s1293_s7, %s1293_s7, %s1294_s8  }
  0x34   :  { %1284 = dma.done.wait [#allocation6], 384  }
  0x35   :  { %1285 = vsyncadd [#allocation6], 4294966912 }
  0x36   :  { %1286 = dma.done.wait [#allocation9], 7168  }
  0x37   :  { %1287 = vsyncadd [#allocation9], 4294960128  ;;  %v1297_v0 = vmov 0.0   ;;  %vm1298_vm0 = vmmov 0   ;;  %v1124_v1 = vld [vmem:[#allocation10] sm:$0xff]   ;;  %v1127_v4 = vld [vmem:[#allocation10 + $0x8] sm:$0xff]  }
  0x38   :  { %1077 = vmatprep.subr.bf16.mxu0 %v1297_v0  ;;  %1093 = vmatprep.mubr.msk.bf16.mxu0 %vm1298_vm0, %v1297_v0  ;;  %v1125_v2 = vld [vmem:[#allocation8 + $0x40] sm:$0xff]   ;;  %v1128_v5 = vld [vmem:[#allocation8 + $0x48] sm:$0xff]   ;;  %v1130_v7 = vld [vmem:[#allocation10 + $0x10] sm:$0xff]   ;;  %vm772_vm2 = vcmask 64512   ;;  %vm845_vm3 = vcmask 57344   ;;  %vm816_vm4 = vcmask 7168  }
  0x39   :  { %1078 = vmatpush3.bf16.msra.mxu0 %v1124_v1  ;;  %v1126_v3 = vld [vmem:[#allocation8] sm:$0xff]   ;;  %1009 = vmatprep.subr.bf16.mxu1 %v1125_v2  ;;  %v1129_v6 = vld [vmem:[#allocation8 + $0x8] sm:$0xff]   ;;  %v1131_v8 = vld [vmem:[#allocation8 + $0x50] sm:$0xff]   ;;  %s1264_s3 = scalar_lea.hbm %s1457_s5, 16 }
  0x3a   :  { %1079 = vmatprep.subr.bf16.mxu0 %v1297_v0  ;;  %1010 = vmatpush3.bf16.msra.mxu1 %v1126_v3  ;;  %v1132_v9 = vld [vmem:[#allocation8 + $0x10] sm:$0xff]   ;;  %v1133_v10 = vld [vmem:[#allocation10 + $0x18] sm:$0xff]   ;;  %v1137_v13 = vld [vmem:[#allocation8 + $0x60] sm:$0xff]   ;;  %p1265_p10 = scmp.ne.s32.totalorder %s1457_s5, %s1264_s3  ;;  %p1268_p11 = scmp.lt.u32.totalorder %s1264_s3, %s1457_s5 }
  0x3b   :  { %1011 = vmatprep.subr.bf16.mxu1 %v1128_v5  ;;  %v1134_v11 = vld [vmem:[#allocation8 + $0x58] sm:$0xff]   ;;  %v1136_v14 = vld [vmem:[#allocation10 + $0x20] sm:$0xff]   ;;  %v1140_v16 = vld [vmem:[#allocation8 + $0x68] sm:$0xff]  }
  0x3c   :  { %v1135_v12 = vld [vmem:[#allocation8 + $0x18] sm:$0xff]   ;;  %v1138_v15 = vld [vmem:[#allocation8 + $0x20] sm:$0xff]   ;;  %v1139_v17 = vld [vmem:[#allocation10 + $0x28] sm:$0xff]   ;;  %p1270_p12 = pnand %p1268_p11, %p1265_p10 }
  0x3d   :  { %1080 = vmatpush3.bf16.msra.mxu0 %v1127_v4  ;;  %v1141_v18 = vld [vmem:[#allocation8 + $0x28] sm:$0xff]   ;;  %v1143_v19 = vld [vmem:[#allocation8 + $0x70] sm:$0xff]   ;;  %v1145_v22 = vld [vmem:[#allocation10 + $0x38] sm:$0xff]  }
  0x3e   :  { %1081 = vmatprep.subr.bf16.mxu0 %v1297_v0  ;;  %1012 = vmatpush3.bf16.msra.mxu1 %v1129_v6  ;;  %v1142_v20 = vld [vmem:[#allocation10 + $0x30] sm:$0xff]   ;;  %v184_v23 = vld [vmem:[#allocation5] sm:$0xff]  ;;  %v1146_v24 = vld [vmem:[#allocation8 + $0x78] sm:$0xff]  }
  0x3f   :  { %1013 = vmatprep.subr.bf16.mxu1 %v1131_v8  ;;  %v1144_v21 = vld [vmem:[#allocation8 + $0x30] sm:$0xff]   ;;  %v947_v25 = vcombine.high %v184_v23, %v184_v23  ;;  %v1147_v26 = vld [vmem:[#allocation8 + $0x38] sm:$0xff]   ;;  %v1150_v27 = vld [vmem:[#allocation8 + $0xc0] sm:$0xff]   ;;  %v946_v31 = vcombine.low %v184_v23, %v184_v23 }
  0x40   :  { %v70_v28 = vld [vmem:[%s1454_s2] sm:$0xf]  ;;  %v1154_v32 = vld [vmem:[#allocation8 + $0xc8] sm:$0xff]   ;;  %v1158_v36 = vld [vmem:[#allocation8 + $0xd0] sm:$0xff]  }
  0x41   :  { %1082 = vmatpush3.bf16.msra.mxu0 %v1130_v7  ;;  %624 = vmatprep.mubr.bf16.mxu1 %v947_v25  ;;  %v1152_v29 = vld [vmem:[#allocation8 + $0x140] sm:$0xff]   ;;  %v1156_v34 = vld [vmem:[#allocation8 + $0x148] sm:$0xff]   ;;  %v1160_v38 = vld [vmem:[#allocation8 + $0x150] sm:$0xff]  }
  0x42   :  { %1083 = vmatprep.subr.bf16.mxu0 %v1297_v0  ;;  %1014 = vmatpush3.bf16.msra.mxu1 %v1132_v9  ;;  %v1151_v30 = vld [vmem:[#allocation8 + $0x80] sm:$0xff]   ;;  %v1155_v35 = vld [vmem:[#allocation8 + $0x88] sm:$0xff]   ;;  %v1159_v39 = vld [vmem:[#allocation8 + $0x90] sm:$0xff]  }
  0x43   :  { %1015 = vmatprep.subr.bf16.mxu1 %v1134_v11  ;;  %v1153_v33 = vld [vmem:[#allocation8 + $0x100] sm:$0xff]   ;;  %v1157_v37 = vld [vmem:[#allocation8 + $0x108] sm:$0xff]   ;;  %v1162_v40 = vld [vmem:[#allocation8 + $0xd8] sm:$0xff]  }
  0x44   :  { %v1161_v41 = vld [vmem:[#allocation8 + $0x110] sm:$0xff]   ;;  %v1164_v42 = vld [vmem:[#allocation8 + $0x158] sm:$0xff]   ;;  %v1166_v44 = vld [vmem:[#allocation8 + $0xe0] sm:$0xff]  }
  0x45   :  { %1084 = vmatpush3.bf16.msra.mxu0 %v1133_v10  ;;  %v1163_v43 = vld [vmem:[#allocation8 + $0x98] sm:$0xff]   ;;  %v1168_v46 = vld [vmem:[#allocation8 + $0x160] sm:$0xff]   ;;  %v1170_v48 = vld [vmem:[#allocation8 + $0xe8] sm:$0xff]  }
  0x46   :  { %1085 = vmatprep.subr.bf16.mxu0 %v1297_v0  ;;  %1016 = vmatpush3.bf16.msra.mxu1 %v1135_v12  ;;  %v1165_v45 = vld [vmem:[#allocation8 + $0x118] sm:$0xff]   ;;  %v1167_v47 = vld [vmem:[#allocation8 + $0xa0] sm:$0xff]   ;;  %v1172_v50 = vld [vmem:[#allocation8 + $0x168] sm:$0xff]  }
  0x47   :  { %1017 = vmatprep.subr.bf16.mxu1 %v1137_v13  ;;  %v1169_v49 = vld [vmem:[#allocation8 + $0x120] sm:$0xff]   ;;  %v1171_v51 = vld [vmem:[#allocation8 + $0xa8] sm:$0xff]   ;;  %v1174_v52 = vld [vmem:[#allocation8 + $0xf0] sm:$0xff]  }
  0x48   :  { %v1173_v53 = vld [vmem:[#allocation8 + $0x128] sm:$0xff]   ;;  %v1176_v54 = vld [vmem:[#allocation8 + $0x170] sm:$0xff]   ;;  %v1178_v56 = vld [vmem:[#allocation8 + $0xf8] sm:$0xff]  }
  0x49   :  { %1086 = vmatpush3.bf16.msra.mxu0 %v1136_v14  ;;  %v1175_v55 = vld [vmem:[#allocation8 + $0xb0] sm:$0xff]   ;;  %v1180_v59 = vld [vmem:[#allocation8 + $0x178] sm:$0xff]  }
  0x4a   :  { %1087 = vmatprep.subr.bf16.mxu0 %v1297_v0  ;;  %1018 = vmatpush3.bf16.msra.mxu1 %v1138_v15  ;;  %v1177_v57 = vld [vmem:[#allocation8 + $0x130] sm:$0xff]   ;;  %v186_v61 = vld [vmem:[#allocation5 + $0x10] sm:$0xff] }
  0x4b   :  { %1019 = vmatprep.subr.bf16.mxu1 %v1140_v16  ;;  %v185_v58 = vld [vmem:[#allocation5 + $0x8] sm:$0xff]  ;;  %v1179_v62 = vld [vmem:[#allocation8 + $0xb8] sm:$0xff]   ;;  %v951_v63 = vcombine.high %v186_v61, %v186_v61  ;;  %v950_v3 = vcombine.low %v186_v61, %v186_v61 }
  0x4c   :  { %v949_v60 = vcombine.high %v185_v58, %v185_v58  ;;  %v1181_v1 = vld [vmem:[#allocation8 + $0x138] sm:$0xff]   ;;  %v948_v2 = vcombine.low %v185_v58, %v185_v58 }
  0x4d   :  { %1088 = vmatpush3.bf16.msra.mxu0 %v1139_v17 }
  0x4e   :  { %1089 = vmatprep.subr.bf16.mxu0 %v1297_v0  ;;  %1020 = vmatpush3.bf16.msra.mxu1 %v1141_v18 }
  0x4f   :  { %1021 = vmatprep.subr.bf16.mxu1 %v1143_v19 }
  0x51   :  { %1090 = vmatpush3.bf16.msra.mxu0 %v1142_v20 }
  0x52   :  { %1091 = vmatprep.subr.bf16.mxu0 %v1297_v0  ;;  %1022 = vmatpush3.bf16.msra.mxu1 %v1144_v21 }
  0x53   :  { %1023 = vmatprep.subr.bf16.mxu1 %v1146_v24 }
  0x55   :  { %1092 = vmatpush3.bf16.msra.mxu0 %v1145_v22 }
  0x56   :  { %1031 = vmatprep.subr.bf16.mxu0 %v1150_v27  ;;  %1024 = vmatpush3.bf16.msra.mxu1 %v1147_v26 }
  0x57   :  { %1053 = vmatprep.subr.bf16.mxu1 %v1152_v29 }
  0x58   :  { %1094 = vmatmul.mubr.bf16.vlgmr.msra.gmra.mrb[0].mxu0 %v70_v28 }
  0x59   :  { %1032 = vmatpush3.bf16.msra.mxu0 %v1151_v30  ;;  %625 = vmatmul.mubr.bf16.vlgmr.msra.gmra.mrb[0].mxu1 %v946_v31 }
  0x5a   :  { %1033 = vmatprep.subr.bf16.mxu0 %v1154_v32  ;;  %1054 = vmatpush3.bf16.msra.mxu1 %v1153_v33 }
  0x5b   :  { %1055 = vmatprep.subr.bf16.mxu1 %v1156_v34  ;;  %664 = vmatprep.mubr.bf16.mxu0 %v949_v60 }
  0x5c   :  { %704 = vmatprep.mubr.bf16.mxu1 %v951_v63 }
  0x5d   :  { %1034 = vmatpush3.bf16.msra.mxu0 %v1155_v35 }
  0x5e   :  { %1035 = vmatprep.subr.bf16.mxu0 %v1158_v36  ;;  %1056 = vmatpush3.bf16.msra.mxu1 %v1157_v37  ;;  %v766_v37 = vlaneseq }
  0x5f   :  { %1057 = vmatprep.subr.bf16.mxu1 %v1160_v38 }
  0x60   :  { %v1394_v38 = vshrl.u32 %v766_v37, 7 }
  0x61   :  { %1036 = vmatpush3.bf16.msra.mxu0 %v1159_v39  ;;  %v1396_v39 = vand.u32 127, %v766_v37 }
  0x62   :  { %1037 = vmatprep.subr.bf16.mxu0 %v1162_v40  ;;  %1058 = vmatpush3.bf16.msra.mxu1 %v1161_v41  ;;  %v783_v40 = vstv %s1456_s4 }
  0x63   :  { %1059 = vmatprep.subr.bf16.mxu1 %v1164_v42  ;;  %vm770_vm1 = vcmp.eq.s32.totalorder %v1394_v38, %v1396_v39 }
  0x65   :  { %1038 = vmatpush3.bf16.msra.mxu0 %v1163_v43 }
  0x66   :  { %1039 = vmatprep.subr.bf16.mxu0 %v1166_v44  ;;  %1060 = vmatpush3.bf16.msra.mxu1 %v1165_v45 }
  0x67   :  { %1061 = vmatprep.subr.bf16.mxu1 %v1168_v46 }
  0x69   :  { %1040 = vmatpush3.bf16.msra.mxu0 %v1167_v47 }
  0x6a   :  { %1041 = vmatprep.subr.bf16.mxu0 %v1170_v48  ;;  %1062 = vmatpush3.bf16.msra.mxu1 %v1169_v49 }
  0x6b   :  { %1063 = vmatprep.subr.bf16.mxu1 %v1172_v50 }
  0x6d   :  { %1042 = vmatpush3.bf16.msra.mxu0 %v1171_v51 }
  0x6e   :  { %1043 = vmatprep.subr.bf16.mxu0 %v1174_v52  ;;  %1064 = vmatpush3.bf16.msra.mxu1 %v1173_v53 }
  0x6f   :  { %1065 = vmatprep.subr.bf16.mxu1 %v1176_v54 }
  0x71   :  { %1044 = vmatpush3.bf16.msra.mxu0 %v1175_v55 }
  0x72   :  { %1045 = vmatprep.subr.bf16.mxu0 %v1178_v56  ;;  %1066 = vmatpush3.bf16.msra.mxu1 %v1177_v57 }
  0x73   :  { %1067 = vmatprep.subr.bf16.mxu1 %v1180_v59 }
  0x75   :  { %1046 = vmatpush3.bf16.msra.mxu0 %v1179_v62 }
  0x76   :  { %1097 = vmatprep.subr.bf16.mxu0 %v1297_v0  ;;  %1068 = vmatpush3.bf16.msra.mxu1 %v1181_v1 }
  0x78   :  { %665 = vmatmul.mubr.bf16.vlgmr.msra.gmra.mrb[4].mxu0 %v948_v2 }
  0x79   :  { %1099 = vmatprep.mubr.msk.bf16.mxu0 %vm1298_vm0, %v1297_v0  ;;  %705 = vmatmul.mubr.bf16.vlgmr.msra.gmra.mrb[4].mxu1 %v950_v3 }
 0x12b   :  { %v169_v4 = vpop.f32.mrb[0].mxu0 }
 0x12c   :  { %v1095_v5 = vpop.f32.mrb[1].mxu0  ;;  %v175_v6 = vmul.f32 %v169_v4, %v169_v4  ;;  %v1025_v7 = vpop.f32.mrb[0].mxu1 }
 0x12d   :  { %v172_v8 = vpop.f32.mrb[2].mxu0  ;;  %v1026_v9 = vpop.f32.mrb[1].mxu1 }
 0x12e   :  { %176 = vadd.xlane.f32.xlu0 %v175_v6  ;;  %v1096_v10 = vpop.f32.mrb[3].mxu0  ;;  %v1027_v11 = vadd.f32 %v1026_v9, %v1025_v7  ;;  %v1028_v12 = vpop.f32.mrb[2].mxu1 }
 0x12f   :  { %v1029_v13 = vpop.f32.mrb[3].mxu1 }
 0x14b   :  { %v1047_v14 = vpop.f32.mrb[4].mxu0 }
 0x14c   :  { %v1048_v15 = vpop.f32.mrb[5].mxu0  ;;  %v1069_v17 = vpop.f32.mrb[4].mxu1 }
 0x14d   :  { %v1049_v16 = vadd.f32 %v1048_v15, %v1047_v14  ;;  %v1050_v18 = vpop.f32.mrb[6].mxu0  ;;  %v1070_v19 = vpop.f32.mrb[5].mxu1 }
 0x14e   :  { %v1051_v20 = vpop.f32.mrb[7].mxu0  ;;  %v1071_v21 = vadd.f32 %v1070_v19, %v1069_v17  ;;  %v1072_v22 = vpop.f32.mrb[6].mxu1 }
 0x14f   :  { %v667_v0 = vadd.f32 %v1049_v16, %v1027_v11  ;;  %v1073_v23 = vpop.f32.mrb[7].mxu1 }
 0x151   :  { %v707_v24 = vadd.f32 %v1071_v21, %v667_v0 }
 0x153   :  { %v718_v25 = vmul.f32 %v707_v24, %v707_v24 }
 0x155   :  { %719 = vadd.xlane.f32.xlu0 %v718_v25 }
 0x1bb   :  { %v177_v26 = vpop.xlane.xlu0 %176 }
 0x1bc   :  { %v178_v27 = vadd.f32 1e-12, %v177_v26 }
 0x1be   :  { %1186 = vrsqrt.f32 %v178_v27 }
 0x1c8   :  { %v1187_v28 = vpop.eup %1186 }
 0x1c9   :  { %v180_v29 = vmul.f32 %v1187_v28, %v169_v4 }
 0x1cb   :  { %v181_v30 = vpack.c.bf16 %v180_v29, %v180_v29 }
 0x1cd   :  { %182 = vst [vmem:[#allocation3] sm:$0xf] %v181_v30 }
 0x1d4   :  { %v725_v31 = vld [vmem:[#allocation3] sm:$0xf] }
 0x1d5   :  { %1098 = vmatpush3.bf16.xpose.msra.mxu0 %v725_v31 }
 0x1e2   :  { %v720_v32 = vpop.xlane.xlu0 %719 }
 0x1e3   :  { %v721_v33 = vadd.f32 1e-12, %v720_v32 }
 0x1e5   :  { %1188 = vrsqrt.f32 %v721_v33 }
 0x1ef   :  { %v1189_v34 = vpop.eup %1188 }
 0x1f0   :  { %v723_v35 = vmul.f32 %v1189_v34, %v707_v24 }
 0x1f2   :  { %v724_v36 = vpack.c.bf16 %v723_v35, %v723_v35 }
 0x1f4   :  { %1100 = vmatmul.mubr.bf16.vlgmr.msra.gmra.mrb[8].mxu0 %v724_v36 }
 0x2c7   :  { %v760_v41 = vpop.f32.mrb[8].mxu0 }
 0x2c8   :  { %v784_v42 = vmul.f32 %v783_v40, %v760_v41  ;;  %v1101_v43 = vpop.f32.mrb[9].mxu0  ;;  %v771_v44 = vsel %vm770_vm1, %v760_v41, 0.0  ;;  %v878_v12 = vadd.f32 0.1, %v760_v41 }
 0x2c9   :  { %v763_v45 = vpop.f32.mrb[10].mxu0  ;;  %v773_v46 = vsel %vm772_vm2, %v771_v44, 0.0 }
 0x2ca   :  { %774 = vadd.xlane.f32.xlu0 %v773_v46  ;;  %v1102_v47 = vpop.f32.mrb[11].mxu0  ;;  %v785_v48 = vsel %vm772_vm2, %v784_v42, -inf  ;;  %v776_v6 = vrot.slane %v773_v46, 4 }
 0x2cb   :  { %786 = vmax.xlane.f32.xlu1 %v785_v48  ;;  %v797_v49 = vrot.slane %v785_v48, 4 }
 0x2cc   :  { %v777_v7 = vadd.f32 %v776_v6, %v773_v46 }
 0x2cd   :  { %v798_v50 = vmax.f32 %v785_v48, %v797_v49 }
 0x2ce   :  { %v778_v8 = vrot.slane %v777_v7, 2 }
 0x2cf   :  { %v799_v51 = vrot.slane %v798_v50, 2 }
 0x2d0   :  { %v779_v9 = vadd.f32 %v778_v8, %v777_v7 }
 0x2d1   :  { %v800_v52 = vmax.f32 %v798_v50, %v799_v51 }
 0x2d2   :  { %v780_v10 = vrot.slane %v779_v9, 1 }
 0x2d3   :  { %v801_v53 = vrot.slane %v800_v52, 1 }
 0x2d4   :  { %v781_v11 = vadd.f32 %v780_v10, %v779_v9 }
 0x2d5   :  { %v802_v54 = vmax.f32 %v800_v52, %v801_v53 }
 0x2d6   :  { %v893_v13 = vsub.f32 %v878_v12, %v781_v11  ;;  %v859_v0 = vsel %vm845_vm3, %v781_v11, 0.0 }
 0x2d7   :  { %v803_v55 = vsub.f32 %v784_v42, %v802_v54 }
 0x2d8   :  { %v894_v14 = vmax.f32 %v893_v13, 0.0 }
 0x2d9   :  { %v804_v56 = vmul.f32 1.442695, %v803_v55 }
 0x2da   :  { %v895_v19 = vsel %vm770_vm1, 0.0, %v894_v14 }
 0x2db   :  { %1190 = vpow2.f32 %v804_v56  ;;  %v896_v21 = vmul.f32 %v895_v19, %v895_v19 }
 0x2dd   :  { %v897_v22 = vsel %vm772_vm2, %v896_v21, 0.0 }
 0x2e5   :  { %v1191_v57 = vpop.eup %1190 }
 0x2e6   :  { %v806_v58 = vsel %vm772_vm2, %v1191_v57, 0.0 }
 0x2e7   :  { %v807_v59 = vrot.slane %v806_v58, 4 }
 0x2e9   :  { %v808_v60 = vadd.f32 %v807_v59, %v806_v58 }
 0x2eb   :  { %v809_v61 = vrot.slane %v808_v60, 2 }
 0x2ed   :  { %v810_v62 = vadd.f32 %v809_v61, %v808_v60 }
 0x2ef   :  { %v811_v63 = vrot.slane %v810_v62, 1 }
 0x2f1   :  { %v812_v1 = vadd.f32 %v811_v63, %v810_v62 }
 0x2f3   :  { %1192 = vlog2.f32 %v812_v1 }
 0x2fd   :  { %v1193_v2 = vpop.eup %1192 }
 0x2fe   :  { %v814_v3 = vmul.f32 0.6931472, %v1193_v2 }
 0x300   :  { %v815_v4 = vadd.f32 %v814_v3, %v802_v54 }
 0x302   :  { %v846_v5 = vsel %vm845_vm3, %v815_v4, 0.0 }
 0x357   :  { %v775_v15 = vpop.xlane.xlu0 %774 }
 0x358   :  { %v787_v16 = vpop.xlane.xlu1 %786  ;;  %v830_v17 = vsel %vm816_vm4, %v775_v15, 0.0  ;;  %v879_v26 = vsub.f32 %v878_v12, %v775_v15 }
 0x359   :  { %v788_v18 = vsub.f32 %v784_v42, %v787_v16  ;;  %831 = vadd.xlane.f32.xlu0 %v830_v17 }
 0x35a   :  { %v880_v29 = vmax.f32 %v879_v26, 0.0 }
 0x35b   :  { %v789_v20 = vmul.f32 1.442695, %v788_v18 }
 0x35c   :  { %v881_v32 = vsel %vm770_vm1, 0.0, %v880_v29 }
 0x35d   :  { %1194 = vpow2.f32 %v789_v20  ;;  %860 = vadd.xlane.f32.xlu0 %v859_v0  ;;  %v882_v33 = vmul.f32 %v881_v32, %v881_v32 }
 0x35f   :  { %v883_v34 = vsel %vm772_vm2, %v882_v33, 0.0 }
 0x361   :  { %898 = vadd.xlane.f32.xlu0 %v897_v22 }
 0x367   :  { %v1195_v23 = vpop.eup %1194 }
 0x368   :  { %v791_v24 = vsel %vm772_vm2, %v1195_v23, 0.0 }
 0x369   :  { %792 = vadd.xlane.f32.xlu1 %v791_v24 }
 0x3e6   :  { %v832_v35 = vpop.xlane.xlu0 %831 }
 0x3e7   :  { %v833_v37 = vrot.slane %v832_v35, 4 }
 0x3e9   :  { %v834_v40 = vadd.f32 %v833_v37, %v832_v35 }
 0x3ea   :  { %v861_v36 = vpop.xlane.xlu0 %860 }
 0x3eb   :  { %v862_v41 = vrot.slane %v861_v36, 4  ;;  %v835_v43 = vrot.slane %v834_v40, 2 }
 0x3ed   :  { %v863_v44 = vadd.f32 %v862_v41, %v861_v36  ;;  %v836_v50 = vadd.f32 %v835_v43, %v834_v40 }
 0x3ee   :  { %v899_v42 = vpop.xlane.xlu0 %898 }
 0x3ef   :  { %v900_v45 = vrot.slane %v899_v42, 4  ;;  %v864_v49 = vrot.slane %v863_v44, 2  ;;  %v837_v57 = vrot.slane %v836_v50, 1 }
 0x3f1   :  { %v901_v38 = vadd.f32 %v900_v45, %v899_v42  ;;  %v865_v58 = vadd.f32 %v864_v49, %v863_v44  ;;  %v838_v3 = vadd.f32 %v837_v57, %v836_v50 }
 0x3f3   :  { %v902_v55 = vrot.slane %v901_v38, 2  ;;  %v866_v4 = vrot.slane %v865_v58, 1 }
 0x3f5   :  { %v903_v2 = vadd.f32 %v902_v55, %v901_v38  ;;  %v867_v9 = vadd.f32 %v866_v4, %v865_v58 }
 0x3f6   :  { %v793_v25 = vpop.xlane.xlu1 %792 }
 0x3f7   :  { %1196 = vlog2.f32 %v793_v25  ;;  %v904_v10 = vrot.slane %v903_v2, 1 }
 0x3f9   :  { %v905_v13 = vadd.f32 %v904_v10, %v903_v2 }
 0x401   :  { %v1197_v27 = vpop.eup %1196 }
 0x402   :  { %v795_v28 = vmul.f32 0.6931472, %v1197_v27 }
 0x404   :  { %v796_v30 = vadd.f32 %v795_v28, %v787_v16 }
 0x406   :  { %v817_v31 = vsel %vm816_vm4, %v796_v30, 0.0 }
 0x407   :  { %818 = vadd.xlane.f32.xlu1 %v817_v31 }
 0x40b   :  { %847 = vadd.xlane.f32.xlu1 %v846_v5 }
 0x40f   :  { %884 = vadd.xlane.f32.xlu1 %v883_v34 }
 0x494   :  { %v819_v46 = vpop.xlane.xlu1 %818 }
 0x495   :  { %v820_v47 = vrot.slane %v819_v46, 4 }
 0x497   :  { %v821_v48 = vadd.f32 %v820_v47, %v819_v46 }
 0x498   :  { %v848_v39 = vpop.xlane.xlu1 %847 }
 0x499   :  { %v822_v51 = vrot.slane %v821_v48, 2  ;;  %v849_v52 = vrot.slane %v848_v39, 4 }
 0x49b   :  { %v850_v53 = vadd.f32 %v849_v52, %v848_v39  ;;  %v823_v54 = vadd.f32 %v822_v51, %v821_v48 }
 0x49c   :  { %v885_v56 = vpop.xlane.xlu1 %884 }
 0x49d   :  { %v851_v59 = vrot.slane %v850_v53, 2  ;;  %v886_v60 = vrot.slane %v885_v56, 4  ;;  %v824_v61 = vrot.slane %v823_v54, 1 }
 0x49f   :  { %v887_v62 = vadd.f32 %v886_v60, %v885_v56  ;;  %v825_v63 = vadd.f32 %v824_v61, %v823_v54  ;;  %v852_v1 = vadd.f32 %v851_v59, %v850_v53 }
 0x4a1   :  { %v888_v5 = vrot.slane %v887_v62, 2  ;;  %1103 = vpush %v825_v63  ;;  %v853_v6 = vrot.slane %v852_v1, 1 }
 0x4a2   :  { %1105 = vpush %v838_v3 }
 0x4a3   :  { %v889_v7 = vadd.f32 %v888_v5, %v887_v62  ;;  %v854_v8 = vadd.f32 %v853_v6, %v852_v1 }
 0x4a5   :  { %1107 = vpush %v854_v8  ;;  %v890_v11 = vrot.slane %v889_v7, 1 }
 0x4a6   :  { %1109 = vpush %v867_v9 }
 0x4a7   :  { %v891_v12 = vadd.f32 %v890_v11, %v889_v7 }
 0x4a9   :  { %1111 = vpush %v891_v12 }
 0x4aa   :  { %1113 = vpush %v905_v13 }
 0x4d2   :  { %s1104_s11 = spop %1103 }
 0x4d3   :  { %s1106_s12 = spop %1105  ;;  %s829_s14 = smul.f32 0.125, %s1104_s11 }
 0x4d4   :  { %s842_s13 = smul.f32 0.125, %s1106_s12 }
 0x4d6   :  { %s1108_s15 = spop %1107  ;;  %s843_s18 = smul.f32 %s842_s13, %s1456_s4 }
 0x4d7   :  { %s1110_s19 = spop %1109  ;;  %s858_s21 = smul.f32 0.125, %s1108_s15 }
 0x4d8   :  { %s871_s20 = smul.f32 0.125, %s1110_s19  ;;  %s844_s25 = ssub.f32 %s829_s14, %s843_s18 }
 0x4da   :  { %s872_s23 = smul.f32 %s871_s20, %s1456_s4  ;;  %s1112_s24 = spop %1111 }
 0x4db   :  { %s1114_s26 = spop %1113 }
 0x4dc   :  { %s873_s27 = ssub.f32 %s858_s21, %s872_s23 }
 0x4dd   :  { %s907_s28 = sadd.f32 %s1114_s26, %s1112_s24 }
 0x4de   :  { %s874_s29 = sadd.f32 %s873_s27, %s844_s25 }
 0x4df   :  { %s908_s30 = smul.f32 0.5, %s907_s28 }
 0x4e0   :  { %s875_s9 = smul.f32 0.5, %s874_s29 }
 0x4e1   :  { %910 = sst [smem:[#allocation12]] %s908_s30 }
 0x4e2   :  { %877 = sst [smem:[#allocation11]] %s875_s9 }
 0x4e3   :  { %1273 = shalt.err (!%p1270_p12)
}
 0x4e4   :  { %s1299_s11 = smov [#allocation11]   ;;  %s1274_s16 = scalar_lea.hbm %s1458_s6, 16 }
 0x4e5   :  { %918 = dma.smem_to_hbm %s1299_s11, 16, %s1457_s5, [#allocation7]  }
 0x4e6   :  { %p1275_p13 = scmp.ne.s32.totalorder %s1458_s6, %s1274_s16  ;;  %p1278_p0 = scmp.lt.u32.totalorder %s1274_s16, %s1458_s6 }
 0x4e8   :  { %p1280_p1 = pnand %p1278_p0, %p1275_p13 }
 0x4ea   :  { %1283 = shalt.err (!%p1280_p1)
}
 0x4eb   :  { %s1300_s21 = smov [#allocation12]  }
 0x4ec   :  { %926 = dma.smem_to_hbm %s1300_s21, 16, %s1458_s6, [#allocation13]  }
 0x4ed   :  { %1288 = dma.done.wait [#allocation7], 16  }
 0x4ee   :  { %1289 = vsyncadd [#allocation7], 4294967280 }
 0x4ef   :  { %1290 = dma.done.wait [#allocation13], 16  }
 0x4f0   :  { %1291 = vsyncadd [#allocation13], 4294967280 }
 0x4f1   :  { %933 = sfence }
 0x4f2   :  { %934 = vsyncpa [#allocation6], 1 }
 0x4f3   :  { %935 = vsyncpa [#allocation9], 1 }
 0x4f4   :  { %936 = vsyncpa [#allocation7], 1 }
 0x4f5   :  { %937 = vsyncpa [#allocation13], 1 }

</bundles_post_ra>
